<compile_context>
chip_gen: v7x
topology: tpu7x:2x2x1
jax: 0.10.0
libtpu: 0.0.40
codegen_flags: <defaults>
</compile_context>

<pallas_src>
import jax
import jax.numpy as jnp
from jax.experimental import pallas as pl
from jax.experimental.pallas import tpu as pltpu

# ----------------------------- configuration (small) -----------------------------
B = 8                       # batch (any multiple works; callers may stack timesteps)
HIDDEN_STATE_DIM = 128      # params.Models.WorldModel.HiddenStateDim
ENC_HIDDEN = 64             # Encoder.HiddenDim
TR_PROJ_DIM = 32            # Encoder.TransProjDim == CausalModel.TrCodeDim
RE_PROJ_DIM = 16            # Encoder.RewProjDim  == CausalModel.ReCodeDim
NUM_CODES_TR = 32           # CausalModel.NumCodesTr
NUM_CODES_RE = 16           # CausalModel.NumCodesRe
CONF_DIM = 16               # Confounder.ConfDim
POST_HIDDEN = 64            # Confounder.HiddenDim
BETA_TR = 0.25              # Quantizer.BetaTransition
BETA_RE = 0.25              # Quantizer.BetaReward

LOSS_WEIGHTS = dict(
    prior_code_align=0.1,
    prior_reg_weight=0.01,
    post_reg=1e-4,
    post_sparsity=1e-3,
    kl_loss_weight=0.1,
)

_VMEM = pl.BlockSpec(memory_space=pltpu.MemorySpace.VMEM)

# packed lane-dense output slab: [q_tr | q_re | hard_tr | hard_re | u_post | pad/loss]
OUT_LANES = 128
_OFF_QTR = 0
_OFF_QRE = _OFF_QTR + TR_PROJ_DIM          # 32
_OFF_HTR = _OFF_QRE + RE_PROJ_DIM          # 48
_OFF_HRE = _OFF_HTR + NUM_CODES_TR         # 80
_OFF_U = _OFF_HRE + NUM_CODES_RE           # 96
_OFF_PAD = _OFF_U + CONF_DIM               # 112  (lane 112 = quant_loss, 113 = causal partial)


# ----------------------------- fused Pallas kernel --------------------------------
def _causal_fused_kernel(h_ref, w_in_ref, s64_ref, s32_ref, bias_ref, out_ref):
    """Whole CausalModel forward in one kernel body.

    Inputs (all VMEM, 5 DMAs total):
      h_ref    : (B, 128)   hidden state
      w_in_ref : (128, 64)  encoder trunk weight
      s64_ref  : (64, 80)   [enc_wtr | enc_wre | post_wmu | post_wlv]
      s32_ref  : (32, 256)  [cb_tr_t | prior_wp | post_w1a | cb_tr | mu_tab | lv_tab |
                             post_w1b | (cb_re_t ; cb_re) stacked on sublanes]
      bias_ref : (8, 128)   row0=[enc_b1|post_b1] row1=[b_heads|prior_bp|b_ml|ee_tr] row2=[ee_re|0]

    Output:
      out_ref  : (B, 128) f32 lane-dense slab (one unmasked store);
                 row0 lanes 112/113 carry quant_loss / in-kernel causal loss.
    """
    f32 = jnp.float32
    bias = bias_ref[...]                       # single (8,128) vld; slice in registers
    bsz = h_ref.shape[0]

    # ---------------- CausalEncoder: shared ReLU trunk + fused dual projection head ------
    z = jnp.dot(h_ref[...], w_in_ref[...], preferred_element_type=f32) + bias[0:1, 0:64]
    z = jnp.maximum(z, 0.0)
    h_heads = (jnp.dot(z, s64_ref[:, 0:48], preferred_element_type=f32)
               + bias[1:2, 0:48])                                   # [h_tr | h_re]
    h_tr = h_heads[:, 0:TR_PROJ_DIM]                                # (B, 32)
    h_re = h_heads[:, TR_PROJ_DIM:TR_PROJ_DIM + RE_PROJ_DIM]        # (B, 16)

    def onehot_argmin(d):
        # distances already drop the argmin-invariant ||z||^2 term; ties -> first index.
        k = d.shape[-1]
        col = jax.lax.broadcasted_iota(jnp.int32, d.shape, 1)
        dmin = jnp.min(d, axis=-1, keepdims=True)
        first = jnp.min(jnp.where(d <= dmin, col, k), axis=-1, keepdims=True)
        return (col == first).astype(f32)

    # ---------------- merged h_tr matmul group: [cb_tr_t | prior_wp | post_w1a] ----------
    tr_mix = jnp.dot(h_tr, s32_ref[:, 0:112], preferred_element_type=f32)   # (B, 112)
    ze_tr = tr_mix[:, 0:32]            # h_tr @ cb_tr_t
    wp_part = tr_mix[:, 32:48]         # h_tr @ prior_wp
    w1a_part = tr_mix[:, 48:112]       # h_tr @ post_w1a

    # ---------------- DualVQQuantizer: transition branch ---------------------------------
    ee_tr = bias[1:2, 96:128]                                        # ||e||^2  (1, 32)
    hard_tr = onehot_argmin(ee_tr - 2.0 * ze_tr)                     # (B, 32) one-hot

    # merged hard_tr matmul group: [cb_tr | mu_tab | lv_tab]
    hard_mix = jnp.dot(hard_tr, s32_ref[:, 112:176], preferred_element_type=f32)  # (B, 64)
    q_tr = hard_mix[:, 0:32]
    mu_tab_part = hard_mix[:, 32:48]
    logvar_prior = hard_mix[:, 48:64]

    # ---------------- DualVQQuantizer: reward branch --------------------------------------
    ee_re = bias[2:3, 0:16]                                          # (1, 16)
    d_re = ee_re - 2.0 * jnp.dot(h_re, s32_ref[0:16, 240:256], preferred_element_type=f32)
    hard_re = onehot_argmin(d_re)                                    # (B, 16)
    q_re = jnp.dot(hard_re, s32_ref[16:32, 240:256], preferred_element_type=f32)

    # ---------------- ConfounderPrior -----------------------------------------------------
    mu_prior = mu_tab_part + wp_part + bias[1:2, 48:64]

    # ---------------- ConfounderPosterior: MLP on [h_proj_tr, code_emb_tr] ----------------
    hid = (w1a_part
           + jnp.dot(q_tr, s32_ref[:, 176:240], preferred_element_type=f32)
           + bias[0:1, 64:128])
    hid = jnp.maximum(hid, 0.0)
    out_ml = (jnp.dot(hid, s64_ref[:, 48:80], preferred_element_type=f32)
              + bias[1:2, 64:96])                                    # [mu_post | logvar_post]
    mu_post = out_ml[:, 0:16]
    logvar_post = out_ml[:, 16:32]
    # TODO(synk): reparameterized sampling omitted; use deterministic posterior mean.
    u_post = mu_post

    # KL( N(mu_post, var_post) || N(mu_prior, var_prior) ), mean over batch, sum over dims.
    dlv = logvar_post - logvar_prior
    kl = 0.5 * (-dlv + jnp.exp(dlv)
                + (mu_post - mu_prior) ** 2 * jnp.exp(-logvar_prior) - 1.0)

    # ---------------- batched loss reductions (pre-scaled, 2 to-scalar sums) --------------
    # TODO(synk): straight-through estimator / codebook-vs-commitment stop_gradient split
    #             only matters for backward; forward value is identical.
    diff_tr = q_tr - h_tr
    diff_re = q_re - h_re
    inv_b = 1.0 / bsz
    quant_contrib = jnp.concatenate([
        ((1.0 + BETA_TR) * inv_b / TR_PROJ_DIM) * (diff_tr * diff_tr),
        ((1.0 + BETA_RE) * inv_b / RE_PROJ_DIM) * (diff_re * diff_re)], axis=-1)   # (B, 48)
    conf_contrib = jnp.concatenate([
        (LOSS_WEIGHTS["kl_loss_weight"] * inv_b) * kl,
        (LOSS_WEIGHTS["prior_reg_weight"] * inv_b / CONF_DIM) * (mu_prior * mu_prior),
        (LOSS_WEIGHTS["post_sparsity"] * inv_b / CONF_DIM) * jnp.abs(u_post)], axis=-1)  # (B, 48)
    quant_loss = jnp.sum(quant_contrib)
    causal_partial = quant_loss + jnp.sum(conf_contrib)   # param-only reg terms added in wrapper

    # ---------------- single unmasked (B,128) store; losses ride in spare lanes -----------
    npad = OUT_LANES - _OFF_PAD
    row = jax.lax.broadcasted_iota(jnp.int32, (bsz, npad), 0)
    col = jax.lax.broadcasted_iota(jnp.int32, (bsz, npad), 1)
    pad = jnp.where((row == 0) & (col == 0), quant_loss,
                    jnp.where((row == 0) & (col == 1), causal_partial, 0.0))
    out_ref[...] = jnp.concatenate([q_tr, q_re, hard_tr, hard_re, u_post, pad], axis=-1)


# ----------------------------- wrapper: packing + single pallas_call ------------------
def pack_params(p):
    """Pack the 24 raw parameters into 4 DMA-friendly slabs + hoisted scalar regularizers.

    Recomputed from the live codebooks every call so derived quantities never go stale.
    """
    cb_tr = p["codebook_tr"]            # (32, 32)  (K, D)
    cb_re = p["codebook_re"]            # (16, 16)
    ee_tr = jnp.sum(cb_tr * cb_tr, axis=-1, keepdims=True).T        # (1, 32)
    ee_re = jnp.sum(cb_re * cb_re, axis=-1, keepdims=True).T        # (1, 16)

    w_in = p["enc_w1"]                                               # (128, 64)
    slab64 = jnp.concatenate(
        [p["enc_wtr"], p["enc_wre"], p["post_wmu"], p["post_wlv"]], axis=1)        # (64, 80)
    slab32 = jnp.concatenate(
        [cb_tr.T, p["prior_wp"], p["post_w1a"],                      # lanes   0:112 (h_tr group)
         cb_tr, p["prior_mu_table"], p["prior_lv_table"],            # lanes 112:176 (hard_tr group)
         p["post_w1b"],                                              # lanes 176:240
         jnp.concatenate([cb_re.T, cb_re], axis=0)], axis=1)         # lanes 240:256 (sublane stack)

    row0 = jnp.concatenate([p["enc_b1"], p["post_b1"]], axis=1)                     # (1, 128)
    row1 = jnp.concatenate([p["enc_btr"], p["enc_bre"], p["prior_bp"],
                            p["post_bmu"], p["post_blv"], ee_tr], axis=1)           # (1, 128)
    row2 = jnp.concatenate([ee_re, jnp.zeros((1, 112), jnp.float32)], axis=1)       # (1, 128)
    bias = jnp.concatenate([row0, row1, row2, jnp.zeros((5, 128), jnp.float32)], axis=0)

    # parameter-only regularizers, hoisted out of the kernel (do not depend on h)
    code_align = jnp.mean((cb_tr @ p["prior_wp"] - p["prior_mu_table"]) ** 2)
    post_l2 = (jnp.sum(p["post_w1a"] ** 2) + jnp.sum(p["post_w1b"] ** 2)
               + jnp.sum(p["post_wmu"] ** 2) + jnp.sum(p["post_wlv"] ** 2))
    hoisted = (LOSS_WEIGHTS["prior_code_align"] * code_align
               + LOSS_WEIGHTS["post_reg"] * post_l2)
    return w_in, slab64, slab32, bias, hoisted


def causal_model_forward(h, p, detach_encoder=True):
    # TODO(synk): forward only; no custom_vjp, so jax.grad through the pallas_call is unsupported.
    h_stable = jax.lax.stop_gradient(h) if detach_encoder else h
    b = h_stable.shape[0]
    w_in, slab64, slab32, bias, hoisted = pack_params(p)

    flops = 2 * b * (HIDDEN_STATE_DIM * ENC_HIDDEN + ENC_HIDDEN * 48 + 32 * 112
                     + 16 * 16 + 32 * 64 + 16 * 16 + 32 * 64 + 64 * 32)
    bytes_accessed = 4 * (b * HIDDEN_STATE_DIM + 128 * 64 + 64 * 80 + 32 * 256
                          + 8 * 128 + b * OUT_LANES)

    slab = pl.pallas_call(
        _causal_fused_kernel,
        out_shape=jax.ShapeDtypeStruct((b, OUT_LANES), jnp.float32),
        in_specs=[_VMEM] * 5,
        out_specs=_VMEM,
        cost_estimate=pl.CostEstimate(flops=int(flops),
                                      transcendentals=2 * b * CONF_DIM,
                                      bytes_accessed=int(bytes_accessed)),
    )(h_stable, w_in, slab64, slab32, bias)

    quant_output_dict = {
        "quantized_tr": slab[:, _OFF_QTR:_OFF_QRE],
        "quantized_re": slab[:, _OFF_QRE:_OFF_HTR],
        "hard_tr": slab[:, _OFF_HTR:_OFF_HRE],
        "hard_re": slab[:, _OFF_HRE:_OFF_U],
        "loss": slab[0, _OFF_PAD],
    }
    u_post = slab[:, _OFF_U:_OFF_PAD]
    causal_loss = slab[0, _OFF_PAD + 1] + hoisted   # add hoisted param-only regularizers
    return quant_output_dict, u_post, causal_loss


# ----------------------------- deterministic params --------------------------------
def init_params(key):
    ks = jax.random.split(key, 16)

    def lin(k, fan_in, fan_out):
        return jax.random.normal(k, (fan_in, fan_out), jnp.float32) / jnp.sqrt(float(fan_in))

    p = {}
    # encoder
    p["enc_w1"] = lin(ks[0], HIDDEN_STATE_DIM, ENC_HIDDEN)
    p["enc_b1"] = jnp.zeros((1, ENC_HIDDEN), jnp.float32)
    p["enc_wtr"] = lin(ks[1], ENC_HIDDEN, TR_PROJ_DIM)
    p["enc_btr"] = jnp.zeros((1, TR_PROJ_DIM), jnp.float32)
    p["enc_wre"] = lin(ks[2], ENC_HIDDEN, RE_PROJ_DIM)
    p["enc_bre"] = jnp.zeros((1, RE_PROJ_DIM), jnp.float32)
    # quantizer codebooks (K, D)
    p["codebook_tr"] = jax.random.normal(ks[3], (NUM_CODES_TR, TR_PROJ_DIM), jnp.float32)
    p["codebook_re"] = jax.random.normal(ks[4], (NUM_CODES_RE, RE_PROJ_DIM), jnp.float32)
    # confounder prior
    p["prior_mu_table"] = 0.1 * jax.random.normal(ks[5], (NUM_CODES_TR, CONF_DIM), jnp.float32)
    p["prior_lv_table"] = jnp.zeros((NUM_CODES_TR, CONF_DIM), jnp.float32)
    p["prior_wp"] = lin(ks[6], TR_PROJ_DIM, CONF_DIM)
    p["prior_bp"] = jnp.zeros((1, CONF_DIM), jnp.float32)
    # confounder posterior MLP (concat weights split into two matmuls)
    p["post_w1a"] = lin(ks[7], TR_PROJ_DIM, POST_HIDDEN)
    p["post_w1b"] = lin(ks[8], TR_PROJ_DIM, POST_HIDDEN)
    p["post_b1"] = jnp.zeros((1, POST_HIDDEN), jnp.float32)
    p["post_wmu"] = lin(ks[9], POST_HIDDEN, CONF_DIM)
    p["post_bmu"] = jnp.zeros((1, CONF_DIM), jnp.float32)
    p["post_wlv"] = lin(ks[10], POST_HIDDEN, CONF_DIM)
    p["post_blv"] = jnp.zeros((1, CONF_DIM), jnp.float32)
    return p


# ----------------------------- main -------------------------------------------------
if __name__ == "__main__":
    key = jax.random.PRNGKey(0)
    k_h, k_p = jax.random.split(key)
    params = init_params(k_p)
    h = jax.random.normal(k_h, (B, HIDDEN_STATE_DIM), jnp.float32)

    fwd = jax.jit(causal_model_forward, static_argnums=(2,))
    quant_out, u_post, causal_loss = fwd(h, params, True)
    jax.block_until_ready((quant_out, u_post, causal_loss))

    assert quant_out["quantized_tr"].shape == (B, TR_PROJ_DIM)
    assert quant_out["quantized_re"].shape == (B, RE_PROJ_DIM)
    assert quant_out["hard_tr"].shape == (B, NUM_CODES_TR)
    assert quant_out["hard_re"].shape == (B, NUM_CODES_RE)
    assert u_post.shape == (B, CONF_DIM)
    assert causal_loss.shape == ()
    # each hard assignment is a valid one-hot
    assert bool(jnp.all(jnp.sum(quant_out["hard_tr"], axis=-1) == 1.0))
    assert bool(jnp.all(jnp.sum(quant_out["hard_re"], axis=-1) == 1.0))
    assert bool(jnp.isfinite(quant_out["loss"]))
    assert bool(jnp.isfinite(causal_loss))
    print("KERNEL_OK")
</pallas_src>

<mosaic_0001>
module attributes {stable_mosaic.version = 11 : i64} {
  func.func @_causal_fused_kernel(%arg0: memref<8x128xf32, #tpu.memory_space<vmem>>, %arg1: memref<128x64xf32, #tpu.memory_space<vmem>>, %arg2: memref<64x80xf32, #tpu.memory_space<vmem>>, %arg3: memref<32x256xf32, #tpu.memory_space<vmem>>, %arg4: memref<8x128xf32, #tpu.memory_space<vmem>>, %arg5: memref<8x128xf32, #tpu.memory_space<vmem>>) attributes {dimension_semantics = [], scalar_prefetch = 0 : i64, scratch_operands = 0 : i64, tpu.core_type = #tpu.core_type<tc>} {
    %c0 = arith.constant 0 : index
    %c0_0 = arith.constant 0 : index
    %0 = vector.load %arg4[%c0, %c0_0] : memref<8x128xf32, #tpu.memory_space<vmem>>, vector<8x128xf32>
    %c0_1 = arith.constant 0 : index
    %c0_2 = arith.constant 0 : index
    %1 = vector.load %arg0[%c0_1, %c0_2] : memref<8x128xf32, #tpu.memory_space<vmem>>, vector<8x128xf32>
    %c0_3 = arith.constant 0 : index
    %c0_4 = arith.constant 0 : index
    %2 = vector.load %arg1[%c0_3, %c0_4] : memref<128x64xf32, #tpu.memory_space<vmem>>, vector<128x64xf32>
    %cst = arith.constant dense<0.000000e+00> : vector<8x64xf32>
    %3 = tpu.matmul %1, %2, %cst {dimension_numbers = #tpu.dot_dimension_numbers<[1], [0], [0], [1], [0, 0, 1, 1], [], []>} : vector<8x128xf32>, vector<128x64xf32>, vector<8x64xf32> -> vector<8x64xf32>
    %4 = vector.extract_strided_slice %0 {offsets = [0, 0], sizes = [1, 64], strides = [1, 1]} : vector<8x128xf32> to vector<1x64xf32>
    %5 = vector.broadcast %4 : vector<1x64xf32> to vector<8x64xf32>
    %6 = arith.addf %3, %5 : vector<8x64xf32>
    %cst_5 = arith.constant 0.000000e+00 : f32
    %7 = vector.broadcast %cst_5 : f32 to vector<8x64xf32>
    %8 = arith.maximumf %6, %7 : vector<8x64xf32>
    %c0_6 = arith.constant 0 : index
    %c0_7 = arith.constant 0 : index
    %9 = vector.load %arg2[%c0_6, %c0_7] : memref<64x80xf32, #tpu.memory_space<vmem>>, vector<64x48xf32>
    %cst_8 = arith.constant dense<0.000000e+00> : vector<8x48xf32>
    %10 = tpu.matmul %8, %9, %cst_8 {dimension_numbers = #tpu.dot_dimension_numbers<[1], [0], [0], [1], [0, 0, 1, 1], [], []>} : vector<8x64xf32>, vector<64x48xf32>, vector<8x48xf32> -> vector<8x48xf32>
    %11 = vector.extract_strided_slice %0 {offsets = [1, 0], sizes = [1, 48], strides = [1, 1]} : vector<8x128xf32> to vector<1x48xf32>
    %12 = vector.broadcast %11 : vector<1x48xf32> to vector<8x48xf32>
    %13 = arith.addf %10, %12 : vector<8x48xf32>
    %14 = vector.extract_strided_slice %13 {offsets = [0, 0], sizes = [8, 32], strides = [1, 1]} : vector<8x48xf32> to vector<8x32xf32>
    %15 = vector.extract_strided_slice %13 {offsets = [0, 32], sizes = [8, 16], strides = [1, 1]} : vector<8x48xf32> to vector<8x16xf32>
    %c0_9 = arith.constant 0 : index
    %c0_10 = arith.constant 0 : index
    %16 = vector.load %arg3[%c0_9, %c0_10] : memref<32x256xf32, #tpu.memory_space<vmem>>, vector<32x112xf32>
    %cst_11 = arith.constant dense<0.000000e+00> : vector<8x112xf32>
    %17 = tpu.matmul %14, %16, %cst_11 {dimension_numbers = #tpu.dot_dimension_numbers<[1], [0], [0], [1], [0, 0, 1, 1], [], []>} : vector<8x32xf32>, vector<32x112xf32>, vector<8x112xf32> -> vector<8x112xf32>
    %18 = vector.extract_strided_slice %17 {offsets = [0, 0], sizes = [8, 32], strides = [1, 1]} : vector<8x112xf32> to vector<8x32xf32>
    %19 = vector.extract_strided_slice %17 {offsets = [0, 32], sizes = [8, 16], strides = [1, 1]} : vector<8x112xf32> to vector<8x16xf32>
    %20 = vector.extract_strided_slice %17 {offsets = [0, 48], sizes = [8, 64], strides = [1, 1]} : vector<8x112xf32> to vector<8x64xf32>
    %21 = vector.extract_strided_slice %0 {offsets = [1, 96], sizes = [1, 32], strides = [1, 1]} : vector<8x128xf32> to vector<1x32xf32>
    %cst_12 = arith.constant 2.000000e+00 : f32
    %22 = vector.broadcast %cst_12 : f32 to vector<8x32xf32>
    %23 = arith.mulf %22, %18 : vector<8x32xf32>
    %24 = vector.broadcast %21 : vector<1x32xf32> to vector<8x32xf32>
    %25 = arith.subf %24, %23 : vector<8x32xf32>
    %26 = tpu.iota {dimensions = array<i32: 1>} : vector<8x32xi32>
    %cst_13 = arith.constant dense<0x7F800000> : vector<8xf32>
    %27 = vector.multi_reduction <minimumf>, %25, %cst_13 [1] : vector<8x32xf32> to vector<8xf32>
    %28 = vector.shape_cast %27 : vector<8xf32> to vector<8x1xf32>
    %29 = vector.broadcast %28 : vector<8x1xf32> to vector<8x32xf32>
    %30 = arith.cmpf ole, %25, %29 : vector<8x32xf32>
    %c32_i32 = arith.constant 32 : i32
    %31 = vector.broadcast %c32_i32 : i32 to vector<8x32xi32>
    %32 = arith.select %30, %26, %31 : vector<8x32xi1>, vector<8x32xi32>
    %cst_14 = arith.constant dense<2147483647> : vector<8xi32>
    %33 = vector.multi_reduction <minsi>, %32, %cst_14 [1] : vector<8x32xi32> to vector<8xi32>
    %34 = vector.shape_cast %33 : vector<8xi32> to vector<8x1xi32>
    %35 = vector.broadcast %34 : vector<8x1xi32> to vector<8x32xi32>
    %36 = arith.cmpi eq, %26, %35 : vector<8x32xi32>
    %37 = arith.extui %36 : vector<8x32xi1> to vector<8x32xi32>
    %38 = arith.sitofp %37 : vector<8x32xi32> to vector<8x32xf32>
    %c0_15 = arith.constant 0 : index
    %c112 = arith.constant 112 : index
    %39 = vector.load %arg3[%c0_15, %c112] : memref<32x256xf32, #tpu.memory_space<vmem>>, vector<32x64xf32>
    %cst_16 = arith.constant dense<0.000000e+00> : vector<8x64xf32>
    %40 = tpu.matmul %38, %39, %cst_16 {dimension_numbers = #tpu.dot_dimension_numbers<[1], [0], [0], [1], [0, 0, 1, 1], [], []>} : vector<8x32xf32>, vector<32x64xf32>, vector<8x64xf32> -> vector<8x64xf32>
    %41 = vector.extract_strided_slice %40 {offsets = [0, 0], sizes = [8, 32], strides = [1, 1]} : vector<8x64xf32> to vector<8x32xf32>
    %42 = vector.extract_strided_slice %40 {offsets = [0, 32], sizes = [8, 16], strides = [1, 1]} : vector<8x64xf32> to vector<8x16xf32>
    %43 = vector.extract_strided_slice %40 {offsets = [0, 48], sizes = [8, 16], strides = [1, 1]} : vector<8x64xf32> to vector<8x16xf32>
    %44 = vector.extract_strided_slice %0 {offsets = [2, 0], sizes = [1, 16], strides = [1, 1]} : vector<8x128xf32> to vector<1x16xf32>
    %c0_17 = arith.constant 0 : index
    %c240 = arith.constant 240 : index
    %45 = vector.load %arg3[%c0_17, %c240] : memref<32x256xf32, #tpu.memory_space<vmem>>, vector<16x16xf32>
    %cst_18 = arith.constant dense<0.000000e+00> : vector<8x16xf32>
    %46 = tpu.matmul %15, %45, %cst_18 {dimension_numbers = #tpu.dot_dimension_numbers<[1], [0], [0], [1], [0, 0, 1, 1], [], []>} : vector<8x16xf32>, vector<16x16xf32>, vector<8x16xf32> -> vector<8x16xf32>
    %cst_19 = arith.constant 2.000000e+00 : f32
    %47 = vector.broadcast %cst_19 : f32 to vector<8x16xf32>
    %48 = arith.mulf %47, %46 : vector<8x16xf32>
    %49 = vector.broadcast %44 : vector<1x16xf32> to vector<8x16xf32>
    %50 = arith.subf %49, %48 : vector<8x16xf32>
    %51 = tpu.iota {dimensions = array<i32: 1>} : vector<8x16xi32>
    %cst_20 = arith.constant dense<0x7F800000> : vector<8xf32>
    %52 = vector.multi_reduction <minimumf>, %50, %cst_20 [1] : vector<8x16xf32> to vector<8xf32>
    %53 = vector.shape_cast %52 : vector<8xf32> to vector<8x1xf32>
    %54 = vector.broadcast %53 : vector<8x1xf32> to vector<8x16xf32>
    %55 = arith.cmpf ole, %50, %54 : vector<8x16xf32>
    %c16_i32 = arith.constant 16 : i32
    %56 = vector.broadcast %c16_i32 : i32 to vector<8x16xi32>
    %57 = arith.select %55, %51, %56 : vector<8x16xi1>, vector<8x16xi32>
    %cst_21 = arith.constant dense<2147483647> : vector<8xi32>
    %58 = vector.multi_reduction <minsi>, %57, %cst_21 [1] : vector<8x16xi32> to vector<8xi32>
    %59 = vector.shape_cast %58 : vector<8xi32> to vector<8x1xi32>
    %60 = vector.broadcast %59 : vector<8x1xi32> to vector<8x16xi32>
    %61 = arith.cmpi eq, %51, %60 : vector<8x16xi32>
    %62 = arith.extui %61 : vector<8x16xi1> to vector<8x16xi32>
    %63 = arith.sitofp %62 : vector<8x16xi32> to vector<8x16xf32>
    %c16 = arith.constant 16 : index
    %c240_22 = arith.constant 240 : index
    %64 = vector.load %arg3[%c16, %c240_22] : memref<32x256xf32, #tpu.memory_space<vmem>>, vector<16x16xf32>
    %cst_23 = arith.constant dense<0.000000e+00> : vector<8x16xf32>
    %65 = tpu.matmul %63, %64, %cst_23 {dimension_numbers = #tpu.dot_dimension_numbers<[1], [0], [0], [1], [0, 0, 1, 1], [], []>} : vector<8x16xf32>, vector<16x16xf32>, vector<8x16xf32> -> vector<8x16xf32>
    %66 = arith.addf %42, %19 : vector<8x16xf32>
    %67 = vector.extract_strided_slice %0 {offsets = [1, 48], sizes = [1, 16], strides = [1, 1]} : vector<8x128xf32> to vector<1x16xf32>
    %68 = vector.broadcast %67 : vector<1x16xf32> to vector<8x16xf32>
    %69 = arith.addf %66, %68 : vector<8x16xf32>
    %c0_24 = arith.constant 0 : index
    %c176 = arith.constant 176 : index
    %70 = vector.load %arg3[%c0_24, %c176] : memref<32x256xf32, #tpu.memory_space<vmem>>, vector<32x64xf32>
    %cst_25 = arith.constant dense<0.000000e+00> : vector<8x64xf32>
    %71 = tpu.matmul %41, %70, %cst_25 {dimension_numbers = #tpu.dot_dimension_numbers<[1], [0], [0], [1], [0, 0, 1, 1], [], []>} : vector<8x32xf32>, vector<32x64xf32>, vector<8x64xf32> -> vector<8x64xf32>
    %72 = arith.addf %20, %71 : vector<8x64xf32>
    %73 = vector.extract_strided_slice %0 {offsets = [0, 64], sizes = [1, 64], strides = [1, 1]} : vector<8x128xf32> to vector<1x64xf32>
    %74 = vector.broadcast %73 : vector<1x64xf32> to vector<8x64xf32>
    %75 = arith.addf %72, %74 : vector<8x64xf32>
    %cst_26 = arith.constant 0.000000e+00 : f32
    %76 = vector.broadcast %cst_26 : f32 to vector<8x64xf32>
    %77 = arith.maximumf %75, %76 : vector<8x64xf32>
    %c0_27 = arith.constant 0 : index
    %c48 = arith.constant 48 : index
    %78 = vector.load %arg2[%c0_27, %c48] : memref<64x80xf32, #tpu.memory_space<vmem>>, vector<64x32xf32>
    %cst_28 = arith.constant dense<0.000000e+00> : vector<8x32xf32>
    %79 = tpu.matmul %77, %78, %cst_28 {dimension_numbers = #tpu.dot_dimension_numbers<[1], [0], [0], [1], [0, 0, 1, 1], [], []>} : vector<8x64xf32>, vector<64x32xf32>, vector<8x32xf32> -> vector<8x32xf32>
    %80 = vector.extract_strided_slice %0 {offsets = [1, 64], sizes = [1, 32], strides = [1, 1]} : vector<8x128xf32> to vector<1x32xf32>
    %81 = vector.broadcast %80 : vector<1x32xf32> to vector<8x32xf32>
    %82 = arith.addf %79, %81 : vector<8x32xf32>
    %83 = vector.extract_strided_slice %82 {offsets = [0, 0], sizes = [8, 16], strides = [1, 1]} : vector<8x32xf32> to vector<8x16xf32>
    %84 = vector.extract_strided_slice %82 {offsets = [0, 16], sizes = [8, 16], strides = [1, 1]} : vector<8x32xf32> to vector<8x16xf32>
    %85 = arith.subf %84, %43 : vector<8x16xf32>
    %cst_29 = arith.constant 0.000000e+00 : f32
    %86 = vector.broadcast %cst_29 : f32 to vector<8x16xf32>
    %87 = arith.subf %86, %85 : vector<8x16xf32>
    %88 = math.exp %85 : vector<8x16xf32>
    %89 = arith.addf %87, %88 : vector<8x16xf32>
    %90 = arith.subf %83, %69 : vector<8x16xf32>
    %91 = arith.mulf %90, %90 : vector<8x16xf32>
    %cst_30 = arith.constant 0.000000e+00 : f32
    %92 = vector.broadcast %cst_30 : f32 to vector<8x16xf32>
    %93 = arith.subf %92, %43 : vector<8x16xf32>
    %94 = math.exp %93 : vector<8x16xf32>
    %95 = arith.mulf %91, %94 : vector<8x16xf32>
    %96 = arith.addf %89, %95 : vector<8x16xf32>
    %cst_31 = arith.constant 1.000000e+00 : f32
    %97 = vector.broadcast %cst_31 : f32 to vector<8x16xf32>
    %98 = arith.subf %96, %97 : vector<8x16xf32>
    %cst_32 = arith.constant 5.000000e-01 : f32
    %99 = vector.broadcast %cst_32 : f32 to vector<8x16xf32>
    %100 = arith.mulf %99, %98 : vector<8x16xf32>
    %101 = arith.subf %41, %14 : vector<8x32xf32>
    %102 = arith.subf %65, %15 : vector<8x16xf32>
    %103 = arith.mulf %101, %101 : vector<8x32xf32>
    %cst_33 = arith.constant 0.0048828125 : f32
    %104 = vector.broadcast %cst_33 : f32 to vector<8x32xf32>
    %105 = arith.mulf %104, %103 : vector<8x32xf32>
    %106 = arith.mulf %102, %102 : vector<8x16xf32>
    %cst_34 = arith.constant 0.009765625 : f32
    %107 = vector.broadcast %cst_34 : f32 to vector<8x16xf32>
    %108 = arith.mulf %107, %106 : vector<8x16xf32>
    %109 = tpu.concatenate %105, %108 in 1 : vector<8x32xf32>, vector<8x16xf32> -> vector<8x48xf32>
    %cst_35 = arith.constant 1.250000e-02 : f32
    %110 = vector.broadcast %cst_35 : f32 to vector<8x16xf32>
    %111 = arith.mulf %110, %100 : vector<8x16xf32>
    %112 = arith.mulf %69, %69 : vector<8x16xf32>
    %cst_36 = arith.constant 7.812500e-05 : f32
    %113 = vector.broadcast %cst_36 : f32 to vector<8x16xf32>
    %114 = arith.mulf %113, %112 : vector<8x16xf32>
    %115 = math.absf %83 : vector<8x16xf32>
    %cst_37 = arith.constant 7.812500e-06 : f32
    %116 = vector.broadcast %cst_37 : f32 to vector<8x16xf32>
    %117 = arith.mulf %116, %115 : vector<8x16xf32>
    %118 = tpu.concatenate %111, %114, %117 in 1 : vector<8x16xf32>, vector<8x16xf32>, vector<8x16xf32> -> vector<8x48xf32>
    %119 = vector.shape_cast %109 : vector<8x48xf32> to vector<1x8x48xf32>
    %cst_38 = arith.constant dense<0.000000e+00> : vector<1xf32>
    %120 = vector.multi_reduction <add>, %119, %cst_38 [1, 2] : vector<1x8x48xf32> to vector<1xf32>
    %121 = vector.shape_cast %120 : vector<1xf32> to vector<1x1x1xf32>
    %122 = vector.extract %121[0, 0, 0] : f32 from vector<1x1x1xf32>
    %123 = vector.shape_cast %118 : vector<8x48xf32> to vector<1x8x48xf32>
    %cst_39 = arith.constant dense<0.000000e+00> : vector<1xf32>
    %124 = vector.multi_reduction <add>, %123, %cst_39 [1, 2] : vector<1x8x48xf32> to vector<1xf32>
    %125 = vector.shape_cast %124 : vector<1xf32> to vector<1x1x1xf32>
    %126 = vector.extract %125[0, 0, 0] : f32 from vector<1x1x1xf32>
    %127 = arith.addf %122, %126 : f32
    %128 = tpu.iota {dimensions = array<i32: 0>} : vector<8x16xi32>
    %129 = tpu.iota {dimensions = array<i32: 1>} : vector<8x16xi32>
    %c0_i32 = arith.constant 0 : i32
    %130 = vector.broadcast %c0_i32 : i32 to vector<8x16xi32>
    %131 = arith.cmpi eq, %128, %130 : vector<8x16xi32>
    %c0_i32_40 = arith.constant 0 : i32
    %132 = vector.broadcast %c0_i32_40 : i32 to vector<8x16xi32>
    %133 = arith.cmpi eq, %129, %132 : vector<8x16xi32>
    %134 = arith.andi %131, %133 : vector<8x16xi1>
    %c0_i32_41 = arith.constant 0 : i32
    %135 = vector.broadcast %c0_i32_41 : i32 to vector<8x16xi32>
    %136 = arith.cmpi eq, %128, %135 : vector<8x16xi32>
    %c1_i32 = arith.constant 1 : i32
    %137 = vector.broadcast %c1_i32 : i32 to vector<8x16xi32>
    %138 = arith.cmpi eq, %129, %137 : vector<8x16xi32>
    %139 = arith.andi %136, %138 : vector<8x16xi1>
    %cst_42 = arith.constant 0.000000e+00 : f32
    %140 = vector.broadcast %127 : f32 to vector<8x16xf32>
    %141 = vector.broadcast %cst_42 : f32 to vector<8x16xf32>
    %142 = arith.select %139, %140, %141 : vector<8x16xi1>, vector<8x16xf32>
    %143 = vector.broadcast %122 : f32 to vector<8x16xf32>
    %144 = arith.select %134, %143, %142 : vector<8x16xi1>, vector<8x16xf32>
    %145 = tpu.concatenate %41, %65, %38, %63, %83, %144 in 1 : vector<8x32xf32>, vector<8x16xf32>, vector<8x32xf32>, vector<8x16xf32>, vector<8x16xf32>, vector<8x16xf32> -> vector<8x128xf32>
    %c0_43 = arith.constant 0 : index
    %c0_44 = arith.constant 0 : index
    %146 = vector.load %arg5[%c0_43, %c0_44] : memref<8x128xf32, #tpu.memory_space<vmem>>, vector<8x128xf32>
    tpu.vector_store %arg5[%c0_43, %c0_44], %145 {strides = array<i32>} : memref<8x128xf32, #tpu.memory_space<vmem>>, vector<8x128xf32>,
    return
  }
}

</mosaic_0001>

<bundles_post_ra>
// kernel: causal_model_forward.1
= control target key start
LH: loop header
LB: loop body
LE: loop exit
PB: predicated region body
PF: predicated region fallthrough
CT: control target
= control target key end

     0   :  { %v1280_v0 = vmov 0.0|0.0   ;;  %vm1281_vm0 = vmmov 0   ;;  %v1282_v4 = vmov 0.0   ;;  %v38_v43 = vlaneseq  ;;  %s1284_s29 = smov 96   ;;  %s1286_s9 = smov 48   ;;  %s1635_s1 = inlined_call_operand.vmem [shape: f32[128,64], index: 1, kind: input, shape index: {}]   ;;  %s1636_s2 = inlined_call_operand.vmem [shape: f32[64,80], index: 2, kind: input, shape index: {}]   ;;  %s1637_s0 = inlined_call_operand.vmem [shape: f32[8,128], index: 0, kind: input, shape index: {}]   ;;  %s1638_s3 = inlined_call_operand.vmem [shape: f32[32,256], index: 3, kind: input, shape index: {}]   ;;  %s1639_s4 = inlined_call_operand.vmem [shape: f32[8,128], index: 4, kind: input, shape index: {}]   ;;  %s1640_s5 = inlined_call_operand.vmem [shape: f32[8,128], index: 5, kind: output, shape index: {}]  }
   0x1   :  { %1135 = vmatprep.subr.bf16.mxu0 %v1280_v0  ;;  %v22_v1 = vld [vmem:[%s1635_s1] sm:$0xff]  ;;  %v23_v2 = vld [vmem:[%s1635_s1 + $0x8] sm:$0xff]  ;;  %v24_v3 = vld [vmem:[%s1635_s1 + $0x10] sm:$0xff]  ;;  %1047 = vmatprep.mubr.msk.f32.mxu0 %vm1281_vm0, %v1282_v4  ;;  %vm125_vm1 = vcmask 523264   ;;  %vm203_vm2 = vcmask 261120   ;;  %vm343_vm3 = vcmask 130048  }
   0x2   :  { %v1136_v5 = vpack.c.bf16 %v23_v2, %v22_v1  ;;  %v25_v6 = vld [vmem:[%s1635_s1 + $0x18] sm:$0xff]  ;;  %1159 = vmatprep.subr.bf16.mxu1 %v1280_v0  ;;  %1066 = vmatprep.mubr.msk.f32.mxu1 %vm1281_vm0, %v1282_v4  ;;  %v26_v8 = vld [vmem:[%s1635_s1 + $0x20] sm:$0xff]  ;;  %v27_v9 = vld [vmem:[%s1635_s1 + $0x28] sm:$0xff]  ;;  %v1454_v44 = vshrl.u32 %v38_v43, 7  ;;  %vm285_vm4 = vcmask 1048320   ;;  %s1287_s10 = smov 112  }
   0x3   :  { %v1139_v7 = vpack.c.bf16 %v25_v6, %v24_v3  ;;  %v1348_v10 = vld [vmem:[%s1636_s2] sm:$0xff]  ;;  %v1353_v11 = vld [vmem:[%s1636_s2 + $0x8] sm:$0xff]  ;;  %v1358_v12 = vld [vmem:[%s1636_s2 + $0x10] sm:$0xff]  ;;  %v1142_v14 = vpack.c.bf16 %v27_v9, %v26_v8  ;;  %s1288_s11 = smov 64   ;;  %s1289_s12 = smov 32   ;;  %vm885_vm11 = vcmask 392192  }
   0x4   :  { %1137 = vmatpush3.bf16.msra.mxu0 %v1136_v5  ;;  %v1363_v13 = vld [vmem:[%s1636_s2 + $0x18] sm:$0xff]  ;;  %v1256_v15 = vpack.i.bf16 %v1353_v11, %v1348_v10  ;;  %v1160_v16 = vpack.c.bf16 %v1353_v11, %v1348_v10  ;;  %v28_v17 = vld [vmem:[%s1635_s1 + $0x30] sm:$0xff]  ;;  %v1382_v20 = vld [vmem:[%s1636_s2 + $0x20] sm:$0xff]  ;;  %v40_v45 = vsub.s32 0, %v1454_v44  ;;  %v123_v62 = vsub.s32 1, %v1454_v44 }
   0x5   :  { %1138 = vmatprep.subr.bf16.mxu0 %v1280_v0  ;;  %v29_v18 = vld [vmem:[%s1635_s1 + $0x38] sm:$0xff]  ;;  %v1163_v19 = vpack.c.bf16 %v1363_v13, %v1358_v12  ;;  %v1387_v21 = vld [vmem:[%s1636_s2 + $0x28] sm:$0xff]  ;;  %v30_v23 = vld [vmem:[%s1635_s1 + $0x40] sm:$0xff]  ;;  %v1494_v5 = vand.u32 127, %v38_v43  ;;  %vm909_vm12 = vcmp.eq.s32.totalorder %v1454_v44, 0 }
   0x6   :  { %1161 = vmatpush3.bf16.msra.mxu1 %v1160_v16  ;;  %v1145_v22 = vpack.c.bf16 %v29_v18, %v28_v17  ;;  %v31_v24 = vld [vmem:[%s1635_s1 + $0x48] sm:$0xff]  ;;  %v1166_v25 = vpack.c.bf16 %v1387_v21, %v1382_v20  ;;  %v32_v27 = vld [vmem:[%s1635_s1 + $0x50] sm:$0xff]  ;;  %v33_v28 = vld [vmem:[%s1635_s1 + $0x58] sm:$0xff]  ;;  %v1266_v11 = vpack.i.bf16 %v1387_v21, %v1382_v20 }
   0x7   :  { %1162 = vmatprep.subr.bf16.mxu1 %v1280_v0  ;;  %v1148_v26 = vpack.c.bf16 %v31_v24, %v30_v23  ;;  %v1151_v29 = vpack.c.bf16 %v33_v28, %v32_v27  ;;  %v34_v30 = vld [vmem:[%s1635_s1 + $0x60] sm:$0xff]  ;;  %v35_v31 = vld [vmem:[%s1635_s1 + $0x68] sm:$0xff]  ;;  %v36_v33 = vld [vmem:[%s1635_s1 + $0x70] sm:$0xff]  ;;  %vm912_vm13 = vcmp.eq.s32.totalorder %v1494_v5, 1  ;;  %vm910_vm14 = vcmp.eq.s32.totalorder %v1494_v5, 0 }
   0x8   :  { %1140 = vmatpush3.bf16.msra.mxu0 %v1139_v7  ;;  %v1154_v32 = vpack.c.bf16 %v35_v31, %v34_v30  ;;  %v37_v34 = vld [vmem:[%s1635_s1 + $0x78] sm:$0xff]  ;;  %v21_v36 = vld [vmem:[%s1637_s0] sm:$0xff]  ;;  %v1431_v37 = vld [vmem:[%s1636_s2 + $0x30] sm:$0xff] }
   0x9   :  { %1141 = vmatprep.subr.bf16.mxu0 %v1280_v0  ;;  %v1157_v35 = vpack.c.bf16 %v37_v34, %v36_v33  ;;  %v1436_v38 = vld [vmem:[%s1636_s2 + $0x38] sm:$0xff]  ;;  %v1444_v40 = vld [vmem:[%s1638_s3 + $0x8] sm:$0xff]  ;;  %s1283_s2 = smov 16   ;;  %v1460_v46 = vld [vmem:[%s1639_s4] sm:$0xff] }
   0xa   :  { %1164 = vmatpush3.bf16.msra.mxu1 %v1163_v19  ;;  %v1169_v39 = vpack.c.bf16 %v1436_v38, %v1431_v37  ;;  %v426_v41 = vld [vmem:[%s1638_s3 + $0x18] sm:$0xff]  ;;  %v1463_v47 = vrot.slane %v1460_v46, %v40_v45  ;;  %v199_v48 = vld [vmem:[%s1638_s3] sm:$0xff]  ;;  %v200_v49 = vld [vmem:[%s1638_s3 + $0x10] sm:$0xff]  ;;  %v1489_v63 = vrot.slane %v1460_v46, %v123_v62  ;;  %v1271_v20 = vpack.i.bf16 %v1436_v38, %v1431_v37 }
   0xb   :  { %1165 = vmatprep.subr.bf16.mxu1 %v1280_v0  ;;  %v1450_v42 = vpack.i.bf16 %v426_v41, %v1444_v40  ;;  %v1172_v53 = vpack.c.bf16 %v200_v49, %v199_v48  ;;  %v1479_v55 = vld [vmem:[%s1638_s3 + $0x20] sm:$0xff]  ;;  %v202_v56 = vld [vmem:[%s1638_s3 + $0x30] sm:$0xff]  ;;  %v1521_v30 = vld [vmem:[%s1638_s3 + $0x38] sm:$0xff] }
   0xc   :  { %1143 = vmatpush3.bf16.msra.mxu0 %v1142_v14  ;;  %v1175_v57 = vpack.c.bf16 %v202_v56, %v1479_v55  ;;  %v1241_v31 = vpack.i.bf16 %v1521_v30, %v202_v56  ;;  %vm913_vm15 = vmand %vm909_vm12, %vm912_vm13 }
   0xd   :  { %1144 = vmatprep.subr.bf16.mxu0 %v1280_v0  ;;  %1222 = vrot.lane.b32.xlu0 %v1450_v42, %s1283_s2 }
   0xe   :  { %1167 = vmatpush3.bf16.msra.mxu1 %v1166_v25 }
   0xf   :  { %1168 = vmatprep.subr.bf16.mxu1 %v1280_v0 }
  0x10   :  { %1146 = vmatpush3.bf16.msra.mxu0 %v1145_v22  ;;  %v1231_v22 = vpack.i.bf16 %v426_v41, %v200_v49 }
  0x11   :  { %1147 = vmatprep.subr.bf16.mxu0 %v1280_v0 }
  0x12   :  { %1170 = vmatpush3.bf16.msra.mxu1 %v1169_v39 }
  0x13   :  { %1171 = vmatprep.subr.bf16.mxu1 %v1280_v0 }
  0x14   :  { %1149 = vmatpush3.bf16.msra.mxu0 %v1148_v26 }
  0x15   :  { %1150 = vmatprep.subr.bf16.mxu0 %v1280_v0 }
  0x18   :  { %1152 = vmatpush3.bf16.msra.mxu0 %v1151_v29  ;;  %v1226_v29 = vpack.i.bf16 %v1444_v40, %v199_v48 }
  0x19   :  { %1153 = vmatprep.subr.bf16.mxu0 %v1280_v0 }
  0x1c   :  { %1155 = vmatpush3.bf16.msra.mxu0 %v1154_v32 }
  0x1d   :  { %1156 = vmatprep.subr.bf16.mxu0 %v1280_v0 }
  0x20   :  { %1158 = vmatpush3.bf16.msra.mxu0 %v1157_v35 }
  0x21   :  { %1183 = vmatprep.subr.bf16.mxu0 %v1280_v0 }
  0x23   :  { %1048 = vmatmul.mubr.f32.vlgmr.msra.gmra.mrb[0].mxu0 %v21_v36 }
  0x24   :  { %1095 = vmatprep.mubr.msk.f32.mxu0 %vm1281_vm0, %v1282_v4 }
  0x7f   :  { %v1223_v58 = vpop.permute.xlu0 %1222 }
  0x80   :  { %v1225_v59 = vunpack.i.h.bf16 %v1223_v58  ;;  %v1224_v60 = vunpack.i.l.bf16 %v1223_v58 }
  0x82   :  { %v1184_v61 = vpack.c.bf16 %v1225_v59, %v1224_v60 }
  0x84   :  { %1185 = vmatpush3.bf16.msra.mxu0 %v1184_v61 }
  0x85   :  { %1186 = vmatprep.subr.bf16.mxu0 %v1280_v0 }
  0xf6   :  { %v108_v50 = vpop.f32.mrb[0].mxu0 }
  0xf7   :  { %v109_v51 = vadd.f32 %v108_v50, %v1463_v47  ;;  %v1049_v52 = vpop.f32.mrb[1].mxu0 }
  0xf9   :  { %v112_v54 = vmax.f32 %v109_v51, 0.0  ;;  %v316_v51 = vld [vmem:[%s1638_s3 + $0x28] sm:$0xff]  ;;  %s1285_s3 = smov 80  }
  0xfa   :  { %v1236_v52 = vpack.i.bf16 %v316_v51, %v1479_v55 }
  0xfb   :  { %1067 = vmatmul.mubr.msk.f32.vlgmr.msra.gmra.mrb[0].mxu1 %vm125_vm1, %v112_v54 }
  0xfc   :  { %1173 = vmatpush3.bf16.msra.mxu1 %v1172_v53  ;;  %1077 = vmatprep.mubr.msk.f32.mxu1 %vm1281_vm0, %v1282_v4  ;;  %v512_v53 = vsub.s32 2, %v1454_v44 }
  0xfd   :  { %1174 = vmatprep.subr.bf16.mxu1 %v1280_v0 }
  0xfe   :  { %v513_v56 = vrot.slane %v1460_v46, %v512_v53 }
 0x100   :  { %1176 = vmatpush3.bf16.msra.mxu1 %v1175_v57 }
 0x101   :  { %1177 = vmatprep.subr.bf16.mxu1 %v1280_v0 }
 0x1ce   :  { %v195_v1 = vpop.f32.mrb[0].mxu1 }
 0x1cf   :  { %v1492_v2 = vadd.f32 %v195_v1, %v1489_v63  ;;  %v1068_v3 = vpop.f32.mrb[1].mxu1 }
 0x1d1   :  { %427 = vrot.lane.b32.xlu0 %v1492_v2, %s1284_s29  ;;  %1078 = vmatmul.mubr.msk.f32.vlgmr.msra.gmra.mrb[2].mxu1 %vm203_vm2, %v1492_v2 }
 0x1d2   :  { %1088 = vmatprep.mubr.msk.f32.mxu1 %vm1281_vm0, %v1282_v4 }
 0x1d5   :  { %290 = vrot.lane.b32.xlu0 %v1494_v5, %s1284_s29 }
 0x243   :  { %v1504_v6 = vpop.permute.xlu0 %427 }
 0x244   :  { %1096 = vmatmul.mubr.msk.f32.vlgmr.msra.gmra.mrb[2].mxu0 %vm343_vm3, %v1504_v6 }
 0x245   :  { %1102 = vmatprep.mubr.msk.f32.mxu0 %vm1281_vm0, %v1282_v4 }
 0x247   :  { %v291_v23 = vpop.permute.xlu0 %290 }
 0x2a4   :  { %v1510_v7 = vpop.f32.mrb[2].mxu1 }
 0x2a5   :  { %v1079_v8 = vpop.f32.mrb[3].mxu1  ;;  %v277_v9 = vmul.f32 2.0, %v1510_v7 }
 0x2a7   :  { %279 = vrot.lane.b32.xlu1 %v277_v9, %s1284_s29 }
 0x317   :  { %v505_v14 = vpop.f32.mrb[2].mxu0 }
 0x318   :  { %v1097_v16 = vpop.f32.mrb[3].mxu0  ;;  %v509_v54 = vmul.f32 2.0, %v505_v14 }
 0x319   :  { %v280_v17 = vpop.permute.xlu1 %279 }
 0x31a   :  { %v282_v18 = vsub.f32 %v1489_v63, %v280_v17  ;;  %v514_v57 = vsub.f32 %v513_v56, %v509_v54 }
 0x31c   :  { %v286_v19 = vsel %vm285_vm4, %v282_v18, inf  ;;  %v515_v58 = vsel %vm343_vm3, %v514_v57, inf }
 0x31d   :  { %287 = vmin.xlane.f32.xlu1 %v286_v19 }
 0x32e   :  { %1232 = vrot.lane.b32.xlu1 %v1231_v22, %s1283_s2 }
 0x3aa   :  { %v288_v24 = vpop.xlane.xlu1 %287 }
 0x3ab   :  { %vm289_vm5 = vcmp.le.f32.partialorder %v282_v18, %v288_v24 }
 0x3ac   :  { %v292_v25 = vsel %vm289_vm5, %v291_v23, 32 }
 0x3ad   :  { %v293_v26 = vsel %vm285_vm4, %v292_v25, 2147483647  ;;  %vm942_vm4 = vcmask 916480  }
 0x3ae   :  { %v295_v27 = vshra.s32 %v293_v26, 16  ;;  %v294_v32 = vand.u32 65535, %v293_v26  ;;  %v1233_v33 = vpop.permute.xlu1 %1232 }
 0x3af   :  { %v1235_v36 = vunpack.i.h.bf16 %v1233_v33  ;;  %v1234_v39 = vunpack.i.l.bf16 %v1233_v33  ;;  %v1251_v33 = vpack.i.bf16 %v1521_v30, %v316_v51 }
 0x3b0   :  { %v297_v28 = vcvt.s32.f32 %v295_v27  ;;  %v296_v35 = vcvt.s32.f32 %v294_v32 }
 0x3b1   :  { %v345_v48 = vsel %vm343_vm3, %v1234_v39, %v1235_v36 }
 0x3b2   :  { %298 = vmin.xlane.f32.xlu0 %v297_v28 }
 0x3c8   :  { %1227 = vrot.lane.b32.xlu0 %v1226_v29, %s1283_s2 }
 0x3cc   :  { %1242 = vrot.lane.b32.xlu0 %v1241_v31, %s1283_s2 }
 0x43f   :  { %v299_v34 = vpop.xlane.xlu0 %298 }
 0x440   :  { %vm300_vm6 = vcmp.eq.f32.partialorder %v297_v28, %v299_v34  ;;  %v305_v60 = vcvt.f32.s32 %v299_v34 }
 0x441   :  { %v301_v41 = vsel %vm300_vm6, %v296_v35, inf }
 0x442   :  { %302 = vmin.xlane.f32.xlu1 %v301_v41  ;;  %v306_v8 = vshll.u32 %v305_v60, 16 }
 0x443   :  { %v1228_v40 = vpop.permute.xlu0 %1227 }
 0x444   :  { %v1230_v43 = vunpack.i.h.bf16 %v1228_v40  ;;  %v1229_v45 = vunpack.i.l.bf16 %v1228_v40 }
 0x446   :  { %v344_v49 = vsel %vm343_vm3, %v1229_v45, %v1230_v43 }
 0x447   :  { %v1178_v50 = vpack.c.bf16 %v345_v48, %v344_v49  ;;  %v1243_v59 = vpop.permute.xlu0 %1242 }
 0x448   :  { %v1245_v1 = vunpack.i.h.bf16 %v1243_v59  ;;  %v1244_v3 = vunpack.i.l.bf16 %v1243_v59 }
 0x449   :  { %1179 = vmatpush3.bf16.msra.mxu1 %v1178_v50 }
 0x44a   :  { %1180 = vmatprep.subr.bf16.mxu1 %v1280_v0  ;;  %v347_v16 = vsel %vm343_vm3, %v1244_v3, %v1245_v1 }
 0x453   :  { %1237 = vrot.lane.b32.xlu1 %v1236_v52, %s1283_s2 }
 0x477   :  { %516 = vmin.xlane.f32.xlu1 %v515_v58 }
 0x488   :  { %1247 = vrot.lane.b32.xlu1 %v1450_v42, %s1285_s3 }
 0x4cf   :  { %v303_v61 = vpop.xlane.xlu1 %302 }
 0x4d0   :  { %v304_v62 = vcvt.f32.s32 %v303_v61 }
 0x4d2   :  { %v307_v55 = vadd.s32 %v306_v8, %v304_v62 }
 0x4d3   :  { %v1238_v9 = vpop.permute.xlu1 %1237 }
 0x4d4   :  { %v1240_v17 = vunpack.i.h.bf16 %v1238_v9  ;;  %v1239_v18 = vunpack.i.l.bf16 %v1238_v9  ;;  %vm308_vm7 = vcmp.eq.s32.totalorder %v1494_v5, %v307_v55 }
 0x4d5   :  { %v1542_v22 = vsel %vm308_vm7, 1.0, %v1282_v4 }
 0x4d6   :  { %v1187_v14 = vpack.c.bf16 %v1245_v1, %v1240_v17  ;;  %v346_v46 = vsel %vm343_vm3, %v1239_v18, %v1240_v17 }
 0x4d7   :  { %v1181_v19 = vpack.c.bf16 %v347_v16, %v346_v46 }
 0x4d8   :  { %1188 = vmatpush3.bf16.msra.mxu0 %v1187_v14 }
 0x4d9   :  { %1182 = vmatpush3.bf16.msra.mxu1 %v1181_v19  ;;  %1189 = vmatprep.subr.bf16.mxu0 %v1280_v0 }
 0x4da   :  { %1195 = vmatprep.subr.bf16.mxu1 %v1280_v0 }
 0x4dc   :  { %1089 = vmatmul.mubr.msk.f32.vlgmr.msra.gmra.mrb[4].mxu1 %vm203_vm2, %v1542_v22 }
 0x4dd   :  { %1132 = vmatprep.mubr.msk.f32.mxu1 %vm1281_vm0, %v1282_v4 }
 0x504   :  { %v517_v23 = vpop.xlane.xlu1 %516 }
 0x505   :  { %vm518_vm8 = vcmp.le.f32.partialorder %v514_v57, %v517_v23 }
 0x506   :  { %v519_v24 = vsel %vm518_vm8, %v1494_v5, 16 }
 0x507   :  { %v520_v25 = vsel %vm343_vm3, %v519_v24, 2147483647 }
 0x508   :  { %v522_v26 = vshra.s32 %v520_v25, 16  ;;  %v521_v28 = vand.u32 65535, %v520_v25  ;;  %v1248_v39 = vpop.permute.xlu1 %1247 }
 0x509   :  { %v1250_v40 = vunpack.i.h.bf16 %v1248_v39  ;;  %v1249_v43 = vunpack.i.l.bf16 %v1248_v39 }
 0x50a   :  { %v524_v27 = vcvt.s32.f32 %v522_v26  ;;  %v523_v31 = vcvt.s32.f32 %v521_v28 }
 0x50b   :  { %v1190_v49 = vpack.c.bf16 %v1250_v40, %v1249_v43 }
 0x50c   :  { %525 = vmin.xlane.f32.xlu0 %v524_v27 }
 0x599   :  { %v526_v29 = vpop.xlane.xlu0 %525 }
 0x59a   :  { %vm527_vm9 = vcmp.eq.f32.partialorder %v524_v27, %v526_v29  ;;  %v532_v42 = vcvt.f32.s32 %v526_v29 }
 0x59b   :  { %v528_v32 = vsel %vm527_vm9, %v523_v31, inf }
 0x59c   :  { %529 = vmin.xlane.f32.xlu0 %v528_v32  ;;  %v533_v30 = vshll.u32 %v532_v42, 16 }
 0x5af   :  { %v1553_v34 = vpop.f32.mrb[4].mxu1 }
 0x5b0   :  { %v1090_v35 = vpop.f32.mrb[5].mxu1  ;;  %v1557_v36 = vadd.f32 %v1553_v34, %v1510_v7 }
 0x5b2   :  { %1252 = vrot.lane.b32.xlu0 %v1251_v33, %s1285_s3 }
 0x5b6   :  { %1257 = vrot.lane.b32.xlu0 %v1256_v15, %s1285_s3 }
 0x5ba   :  { %1267 = vrot.lane.b32.xlu0 %v1266_v11, %s1285_s3 }
 0x629   :  { %v530_v41 = vpop.xlane.xlu0 %529 }
 0x62a   :  { %v531_v45 = vcvt.f32.s32 %v530_v41 }
 0x62c   :  { %v534_v48 = vadd.s32 %v533_v30, %v531_v45 }
 0x62d   :  { %v1253_v50 = vpop.permute.xlu0 %1252 }
 0x62e   :  { %vm535_vm10 = vcmp.eq.s32.totalorder %v1494_v5, %v534_v48  ;;  %v1255_v51 = vunpack.i.h.bf16 %v1253_v50  ;;  %v1254_v52 = vunpack.i.l.bf16 %v1253_v50 }
 0x62f   :  { %v1566_v53 = vsel %vm535_vm10, 1.0, %v1282_v4 }
 0x630   :  { %1103 = vmatmul.mubr.msk.f32.vlgmr.msra.gmra.mrb[4].mxu0 %vm343_vm3, %v1566_v53  ;;  %v1193_v10 = vpack.c.bf16 %v1255_v51, %v1254_v52 }
 0x631   :  { %1191 = vmatpush3.bf16.msra.mxu0 %v1190_v49  ;;  %1113 = vmatprep.mubr.msk.f32.mxu0 %vm1281_vm0, %v1282_v4  ;;  %v1261_v4 = vpack.i.bf16 %v1363_v13, %v1358_v12  ;;  %v1258_v21 = vpop.permute.xlu0 %1257  ;;  %vm911_vm0 = vmand %vm909_vm12, %vm910_vm14 }
 0x632   :  { %1192 = vmatprep.subr.bf16.mxu0 %v1280_v0  ;;  %v1260_v58 = vunpack.i.h.bf16 %v1258_v21  ;;  %v1259_v59 = vunpack.i.l.bf16 %v1258_v21 }
 0x634   :  { %v1196_v60 = vpack.c.bf16 %v1260_v58, %v1259_v59 }
 0x635   :  { %1194 = vmatpush3.bf16.msra.mxu0 %v1193_v10  ;;  %v1268_v38 = vpop.permute.xlu0 %1267 }
 0x636   :  { %1197 = vmatpush3.bf16.msra.mxu1 %v1196_v60  ;;  %v1270_v55 = vunpack.i.h.bf16 %v1268_v38  ;;  %v1269_v16 = vunpack.i.l.bf16 %v1268_v38 }
 0x637   :  { %1198 = vmatprep.subr.bf16.mxu1 %v1280_v0 }
 0x638   :  { %1114 = vmatmul.mubr.msk.f32.vlgmr.msra.gmra.mrb[6].mxu0 %vm203_vm2, %v1553_v34 }
 0x703   :  { %v1578_v15 = vpop.f32.mrb[4].mxu0 }
 0x704   :  { %v1104_v54 = vpop.f32.mrb[5].mxu0  ;;  %v856_v52 = vsub.f32 %v1578_v15, %v1504_v6 }
 0x706   :  { %v859_v54 = vmul.f32 %v856_v52, %v856_v52 }
 0x70b   :  { %v700_v56 = vpop.f32.mrb[6].mxu0 }
 0x70c   :  { %705 = vrot.lane.b32.xlu1 %v700_v56, %s1286_s9  ;;  %v1115_v57 = vpop.f32.mrb[7].mxu0 }
 0x70d   :  { %v860_v57 = vmul.f32 0.009765625, %v859_v54 }
 0x710   :  { %710 = vrot.lane.b32.xlu1 %v1463_v47, %s1287_s10  ;;  %v839_v47 = vsub.f32 0.0, %v1553_v34 }
 0x712   :  { %v840_v13 = vmul.f32 1.442695, %v839_v47 }
 0x714   :  { %1262 = vrot.lane.b32.xlu1 %v1261_v4, %s1285_s3  ;;  %1276 = vpow2.f32 %v840_v13 }
 0x718   :  { %1272 = vrot.lane.b32.xlu1 %v1271_v20, %s1285_s3  ;;  %v854_v20 = vsub.f32 %v1553_v34, %v1492_v2 }
 0x71a   :  { %v857_v21 = vmul.f32 %v854_v20, %v854_v20 }
 0x71c   :  { %615 = vrot.lane.b32.xlu1 %v1489_v63, %s1287_s10 }
 0x71e   :  { %v1277_v19 = vpop.eup %1276 }
 0x77e   :  { %v706_v12 = vpop.permute.xlu1 %705 }
 0x77f   :  { %v708_v61 = vadd.f32 %v706_v12, %v1510_v7  ;;  %v1202_v7 = vpack.c.bf16 %v1270_v55, %v1269_v16  ;;  %v858_v12 = vmul.f32 0.0048828125, %v857_v21 }
 0x782   :  { %v711_v62 = vpop.permute.xlu1 %710 }
 0x783   :  { %v713_v37 = vadd.f32 %v711_v62, %v708_v61 }
 0x785   :  { %v714_v1 = vmax.f32 %v713_v37, 0.0 }
 0x786   :  { %v1263_v3 = vpop.permute.xlu1 %1262 }
 0x787   :  { %v1265_v8 = vunpack.i.h.bf16 %v1263_v3  ;;  %v1264_v9 = vunpack.i.l.bf16 %v1263_v3  ;;  %716 = vrot.lane.b32.xlu0 %v714_v1, %s1285_s3 }
 0x789   :  { %v1199_v17 = vpack.c.bf16 %v1265_v8, %v1264_v9 }
 0x78a   :  { %v1273_v18 = vpop.permute.xlu1 %1272 }
 0x78b   :  { %v1275_v14 = vunpack.i.h.bf16 %v1273_v18  ;;  %v1274_v46 = vunpack.i.l.bf16 %v1273_v18  ;;  %750 = vrot.lane.b32.xlu0 %v1489_v63, %s1288_s11  ;;  %1200 = vmatpush3.bf16.msra.mxu1 %v1199_v17 }
 0x78c   :  { %1201 = vmatprep.subr.bf16.mxu1 %v1280_v0 }
 0x78d   :  { %v1205_v24 = vpack.c.bf16 %v1275_v14, %v1274_v46 }
 0x78e   :  { %v616_v23 = vpop.permute.xlu1 %615 }
 0x78f   :  { %v618_v25 = vadd.f32 %v616_v23, %v1557_v36  ;;  %843 = vrot.lane.b32.xlu0 %v1277_v19, %s1285_s3  ;;  %1203 = vmatpush3.bf16.msra.mxu1 %v1202_v7 }
 0x790   :  { %1204 = vmatprep.subr.bf16.mxu1 %v1280_v0 }
 0x791   :  { %834 = vrot.lane.b32.xlu1 %v618_v25, %s1284_s29  ;;  %v867_v36 = vmul.f32 %v618_v25, %v618_v25 }
 0x793   :  { %1206 = vmatpush3.bf16.msra.mxu1 %v1205_v24  ;;  %v868_v0 = vmul.f32 7.8125e-05, %v867_v36 }
 0x795   :  { %825 = vrot.lane.b32.xlu1 %v1553_v34, %s1284_s29 }
 0x7f9   :  { %v717_v63 = vpop.permute.xlu0 %716 }
 0x7fa   :  { %1133 = vmatmul.mubr.msk.f32.vlgmr.msra.gmra.mrb[6].mxu1 %vm125_vm1, %v717_v63  ;;  %vm938_vm1 = vcmask 654336  }
 0x7fd   :  { %v751_v26 = vpop.permute.xlu0 %750 }
 0x801   :  { %v844_v35 = vpop.permute.xlu0 %843 }
 0x803   :  { %v835_v31 = vpop.permute.xlu1 %834 }
 0x807   :  { %v826_v40 = vpop.permute.xlu1 %825 }
 0x8cd   :  { %v821_v27 = vpop.f32.mrb[6].mxu1 }
 0x8ce   :  { %v822_v28 = vadd.f32 %v821_v27, %v751_v26  ;;  %v1134_v29 = vpop.f32.mrb[7].mxu1 }
 0x8d0   :  { %v837_v32 = vsub.f32 %v822_v28, %v835_v31  ;;  %v869_v39 = vand.u32 2147483647, %v822_v28  ;;  %v828_v43 = vsub.f32 %v822_v28, %v826_v40 }
 0x8d2   :  { %v838_v33 = vmul.f32 %v837_v32, %v837_v32  ;;  %v870_v41 = vmul.f32 7.8125e-06, %v869_v39  ;;  %v830_v30 = vmul.f32 1.442695, %v828_v43  ;;  %v829_v48 = vsub.f32 0.0, %v828_v43 }
 0x8d4   :  { %v846_v42 = vmul.f32 %v844_v35, %v838_v33  ;;  %1278 = vpow2.f32 %v830_v30 }
 0x8d6   :  { %848 = vrot.lane.b32.xlu0 %v846_v42, %s1283_s2 }
 0x8da   :  { %876 = vrot.lane.b32.xlu0 %v868_v0, %s1287_s10 }
 0x8de   :  { %880 = vrot.lane.b32.xlu0 %v870_v41, %s1289_s12  ;;  %v1279_v45 = vpop.eup %1278 }
 0x8df   :  { %v832_v49 = vadd.f32 %v1279_v45, %v829_v48 }
 0x948   :  { %v849_v50 = vpop.permute.xlu0 %848 }
 0x949   :  { %v851_v51 = vadd.f32 %v849_v50, %v832_v49 }
 0x94b   :  { %v958_v10 = vadd.f32 -1.0, %v851_v51 }
 0x94c   :  { %v877_v4 = vpop.permute.xlu0 %876 }
 0x94d   :  { %v853_v11 = vmul.f32 0.5, %v958_v10 }
 0x94f   :  { %v866_v56 = vmul.f32 0.0125, %v853_v11 }
 0x950   :  { %v881_v59 = vpop.permute.xlu0 %880 }
 0x951   :  { %872 = vrot.lane.b32.xlu1 %v866_v56, %s1287_s10 }
 0x955   :  { %862 = vrot.lane.b32.xlu1 %v860_v57, %s1289_s12 }
 0x9c3   :  { %v873_v58 = vpop.permute.xlu1 %872 }
 0x9c4   :  { %v883_v60 = vsel %vm343_vm3, %v873_v58, %v877_v4  ;;  %vm940_vm3 = vcmask 785408  }
 0x9c5   :  { %v884_v6 = vsel %vm203_vm2, %v883_v60, %v881_v59 }
 0x9c6   :  { %v896_v47 = vsel %vm885_vm11, %v884_v6, 0.0 }
 0x9c7   :  { %897 = vadd.xlane.f32.xlu0 %v896_v47  ;;  %v863_v13 = vpop.permute.xlu1 %862 }
 0x9c8   :  { %v865_v61 = vsel %vm203_vm2, %v858_v12, %v863_v13 }
 0x9c9   :  { %v886_v62 = vsel %vm885_vm11, %v865_v61, 0.0 }
 0x9ca   :  { %887 = vadd.xlane.f32.xlu1 %v886_v62 }
 0x9db   :  { %922 = vrot.lane.b32.xlu1 %v1542_v22, %s1286_s9 }
 0x9dd   :  { %919 = vrot.lane.b32.xlu0 %v1578_v15, %s1289_s12 }
 0x9df   :  { %925 = vrot.lane.b32.xlu1 %v1566_v53, %s1285_s3 }
 0x9e1   :  { %929 = vrot.lane.b32.xlu0 %v822_v28, %s1284_s29 }
 0xa54   :  { %v898_v2 = vpop.xlane.xlu0 %897 }
 0xa55   :  { %v899_v37 = vrot.slane %v898_v2, 4 }
 0xa57   :  { %v900_v38 = vadd.f32 %v899_v37, %v898_v2  ;;  %v888_v1 = vpop.xlane.xlu1 %887 }
 0xa58   :  { %v889_v3 = vrot.slane %v888_v1, 4  ;;  %v920_v24 = vpop.permute.xlu0 %919 }
 0xa59   :  { %v901_v8 = vrot.slane %v900_v38, 2  ;;  %v936_v44 = vsel %vm203_vm2, %v1553_v34, %v920_v24 }
 0xa5a   :  { %v890_v9 = vadd.f32 %v889_v3, %v888_v1 }
 0xa5b   :  { %v902_v55 = vadd.f32 %v901_v8, %v900_v38  ;;  %v923_v23 = vpop.permute.xlu1 %922 }
 0xa5c   :  { %v891_v16 = vrot.slane %v890_v9, 2  ;;  %v937_v63 = vsel %vm885_vm11, %v936_v44, %v923_v23  ;;  %v930_v26 = vpop.permute.xlu0 %929 }
 0xa5d   :  { %v903_v18 = vrot.slane %v902_v55, 1 }
 0xa5e   :  { %v892_v17 = vadd.f32 %v891_v16, %v890_v9 }
 0xa5f   :  { %v904_v46 = vadd.f32 %v903_v18, %v902_v55  ;;  %v926_v25 = vpop.permute.xlu1 %925 }
 0xa60   :  { %v893_v22 = vrot.slane %v892_v17, 1  ;;  %v939_v5 = vsel %vm938_vm1, %v937_v63, %v926_v25 }
 0xa61   :  { %v941_v27 = vsel %vm940_vm3, %v939_v5, %v930_v26 }
 0xa62   :  { %v894_v14 = vadd.f32 %v893_v22, %v892_v17 }
 0xa64   :  { %1207 = vpush %v894_v14 }
 0xa65   :  { %1209 = vpush %v904_v46 }
 0xa95   :  { %s1208_s13 = spop %1207 }
 0xa96   :  { %s1210_s14 = spop %1209  ;;  %v916_v15 = vstv %s1208_s13 }
 0xa97   :  { %s906_s15 = sadd.f32 %s1210_s14, %s1208_s13 }
 0xa99   :  { %v914_v53 = vstv %s906_s15 }
 0xa9a   :  { %v915_v7 = vsel %vm913_vm15, %v914_v53, 0.0 }
 0xa9b   :  { %v917_v19 = vsel %vm911_vm0, %v916_v15, %v915_v7 }
 0xa9c   :  { %933 = vrot.lane.b32.xlu1 %v917_v19, %s1287_s10 }
 0xb0e   :  { %v934_v28 = vpop.permute.xlu1 %933 }
 0xb0f   :  { %v943_v29 = vsel %vm942_vm4, %v941_v27, %v934_v28 }
 0xb10   :  { %944 = vst [vmem:[%s1640_s5] sm:$0xff] %v943_v29 }

</bundles_post_ra>
